<compile_context>
chip_gen: v7x
topology: tpu7x:2x2x1
jax: 0.10.0
libtpu: 0.0.40
codegen_flags: <defaults>
</compile_context>

<pallas_src>
import jax
import jax.numpy as jnp
import numpy as np
from jax.experimental import pallas as pl
from jax.experimental.pallas import tpu as pltpu


def _round_up(x: int, m: int) -> int:
    return ((x + m - 1) // m) * m


def _build_tables(in_features: int, num_frequencies: int):
    """Constant tables: scaled gather masks, phase offsets, linear-column mask."""
    out_dim = in_features + 2 * in_features * num_frequencies

    w = np.zeros((in_features, out_dim), np.float32)   # scale * 0/1 gather
    phase = np.zeros((1, out_dim), np.float32)         # +pi/2 on cos columns
    is_lin = np.zeros((1, out_dim), np.float32)        # 1.0 -> pass-through

    for j in range(in_features):
        w[j, j] = 1.0                                   # identity columns
        is_lin[0, j] = 1.0
    for i in range(num_frequencies):
        s = np.float32(2.0 ** i * np.pi)
        for j in range(in_features):
            col = in_features + 2 * (i * in_features + j)
            w[j, col] = s                               # sin column
            w[j, col + 1] = s                           # cos column
            phase[0, col + 1] = np.float32(np.pi / 2.0)
    return jnp.asarray(w), jnp.asarray(phase), jnp.asarray(is_lin), out_dim


def _pos_enc_kernel(c_ref, w_ref, phase_ref, islin_ref, o_ref):
    c = c_ref[...]                                      # (TB, F) f32
    n_feat = c.shape[1]
    # Gather+scale via exact f32 VPU broadcast-FMAs (F is tiny, fully
    # unrolled).  Phase offset folded into the first term.
    ang = phase_ref[...] + c[:, 0:1] * w_ref[0:1, :]    # (TB, OUT)
    for j in range(1, n_feat):
        ang = ang + c[:, j : j + 1] * w_ref[j : j + 1, :]
    # Single sin pass; linear columns (ang == x_j) pass straight through.
    # One vsel instead of the old 2-mul/1-add/1-sub arithmetic blend.
    o_ref[...] = jnp.where(islin_ref[...] != 0.0, ang, jnp.sin(ang))


def pos_encoding_forward(coords, in_features: int, num_frequencies: int = 13,
                         block_b: int = 4096):
    """Pallas equivalent of PosEncoding.forward (assumes N == 1)."""
    B = coords.shape[0]
    c2 = jnp.reshape(coords, (B, -1)).astype(jnp.float32)
    # The PyTorch module's final reshape(1, B, out_dim) implies N == 1.
    assert c2.shape[1] == in_features, "coords must flatten to (B, in_features)"

    w, phase, is_lin, out_dim = _build_tables(in_features, num_frequencies)

    # Step count: (a) tiles <= block_b rows, (b) last tile not mostly padding,
    # (c) >= 2 steps when the batch allows it so v7x's 2 TensorCores both work.
    g = max(1, -(-B // block_b))
    if g == 1 and B > 8:
        g = 2
    tb = max(8, _round_up(-(-B // g), 8))               # multiple of 8 sublanes
    b_pad = _round_up(B, tb)
    if b_pad != B:
        c2 = jnp.pad(c2, ((0, b_pad - B), (0, 0)))
    grid = (b_pad // tb,)

    out2d = pl.pallas_call(
        _pos_enc_kernel,
        out_shape=jax.ShapeDtypeStruct((b_pad, out_dim), jnp.float32),
        grid_spec=pltpu.PrefetchScalarGridSpec(
            num_scalar_prefetch=0,
            grid=grid,
            in_specs=[
                pl.BlockSpec((tb, in_features), lambda i: (i, 0)),       # coords
                pl.BlockSpec((in_features, out_dim), lambda i: (0, 0)),  # scaled masks
                pl.BlockSpec((1, out_dim), lambda i: (0, 0)),            # phase
                pl.BlockSpec((1, out_dim), lambda i: (0, 0)),            # is_linear
            ],
            out_specs=pl.BlockSpec((tb, out_dim), lambda i: (i, 0)),
        ),
        compiler_params=pltpu.CompilerParams(
            dimension_semantics=("parallel",),
            vmem_limit_bytes=32 * 1024 * 1024,   # explicit: covers v5e's 16 MiB default
        ),
    )(c2, w, phase, is_lin)

    if b_pad != B:
        out2d = out2d[:B]                        # cheap row-prefix slice only
    return out2d.reshape(1, B, out_dim)


def pos_encoding_reference(coords, in_features: int, num_frequencies: int = 13):
    """Plain-JAX mirror of the PyTorch loop, for verification."""
    B = coords.shape[0]
    c = jnp.reshape(coords, (B, -1, in_features)).astype(jnp.float32)
    parts = [c]
    for i in range(num_frequencies):
        for j in range(in_features):
            s = np.float32(2.0 ** i * np.pi)
            cc = c[..., j]
            parts.append(jnp.sin(s * cc)[..., None])
            parts.append(jnp.cos(s * cc)[..., None])
    enc = jnp.concatenate(parts, axis=-1)
    out_dim = in_features + 2 * in_features * num_frequencies
    return enc.reshape(1, B, out_dim)


if __name__ == "__main__":
    IN_FEATURES = 4
    NUM_FREQ = 13
    BATCH = 8

    key = jax.random.PRNGKey(0)
    coords = jax.random.uniform(
        key, (BATCH, IN_FEATURES), dtype=jnp.float32, minval=-1.0, maxval=1.0
    )

    out = jax.block_until_ready(pos_encoding_forward(coords, IN_FEATURES, NUM_FREQ))
    ref = jax.block_until_ready(pos_encoding_reference(coords, IN_FEATURES, NUM_FREQ))

    expected_out_dim = IN_FEATURES + 2 * IN_FEATURES * NUM_FREQ
    assert out.shape == (1, BATCH, expected_out_dim), out.shape
    np.testing.assert_allclose(np.asarray(out), np.asarray(ref), rtol=0.0, atol=2e-2)

    # Exercise the multi-step (grid > 1) + row-padding path as well.
    coords2 = jax.random.uniform(
        jax.random.PRNGKey(1), (12, IN_FEATURES), dtype=jnp.float32,
        minval=-1.0, maxval=1.0,
    )
    out2 = jax.block_until_ready(pos_encoding_forward(coords2, IN_FEATURES, NUM_FREQ))
    ref2 = jax.block_until_ready(pos_encoding_reference(coords2, IN_FEATURES, NUM_FREQ))
    assert out2.shape == (1, 12, expected_out_dim), out2.shape
    np.testing.assert_allclose(np.asarray(out2), np.asarray(ref2), rtol=0.0, atol=2e-2)

    print("KERNEL_OK")
</pallas_src>

<mosaic_0001>
module attributes {stable_mosaic.version = 11 : i64} {
  func.func @_pos_enc_kernel(%arg0: i32, %arg1: memref<8x4xf32, #tpu.memory_space<vmem>>, %arg2: memref<4x108xf32, #tpu.memory_space<vmem>>, %arg3: memref<1x108xf32, #tpu.memory_space<vmem>>, %arg4: memref<1x108xf32, #tpu.memory_space<vmem>>, %arg5: memref<8x108xf32, #tpu.memory_space<vmem>>) attributes {dimension_semantics = [#tpu.dimension_semantics<parallel>], iteration_bounds = array<i64: 1>, scalar_prefetch = 0 : i64, scratch_operands = 0 : i64, tpu.core_type = #tpu.core_type<tc>, window_params = [{transform_indices = @transform_0, window_bounds = array<i64: 8, 4>}, {pipeline_mode = #tpu.pipeline_mode<synchronous>, transform_indices = @transform_1, window_bounds = array<i64: 4, 108>}, {pipeline_mode = #tpu.pipeline_mode<synchronous>, transform_indices = @transform_2, window_bounds = array<i64: 1, 108>}, {pipeline_mode = #tpu.pipeline_mode<synchronous>, transform_indices = @transform_3, window_bounds = array<i64: 1, 108>}, {transform_indices = @transform_4, window_bounds = array<i64: 8, 108>}]} {
    %c0 = arith.constant 0 : index
    %c0_0 = arith.constant 0 : index
    %0 = vector.load %arg1[%c0, %c0_0] : memref<8x4xf32, #tpu.memory_space<vmem>>, vector<8x4xf32>
    %c0_1 = arith.constant 0 : index
    %c0_2 = arith.constant 0 : index
    %1 = vector.load %arg3[%c0_1, %c0_2] : memref<1x108xf32, #tpu.memory_space<vmem>>, vector<1x108xf32>
    %2 = vector.extract_strided_slice %0 {offsets = [0, 0], sizes = [8, 1], strides = [1, 1]} : vector<8x4xf32> to vector<8x1xf32>
    %c0_3 = arith.constant 0 : index
    %c0_4 = arith.constant 0 : index
    %3 = vector.load %arg2[%c0_3, %c0_4] : memref<4x108xf32, #tpu.memory_space<vmem>>, vector<1x108xf32>
    %4 = vector.broadcast %2 : vector<8x1xf32> to vector<8x108xf32>
    %5 = vector.broadcast %3 : vector<1x108xf32> to vector<8x108xf32>
    %6 = arith.mulf %4, %5 : vector<8x108xf32>
    %7 = vector.broadcast %1 : vector<1x108xf32> to vector<8x108xf32>
    %8 = arith.addf %7, %6 : vector<8x108xf32>
    %9 = vector.extract_strided_slice %0 {offsets = [0, 1], sizes = [8, 1], strides = [1, 1]} : vector<8x4xf32> to vector<8x1xf32>
    %c1 = arith.constant 1 : index
    %c0_5 = arith.constant 0 : index
    %10 = vector.load %arg2[%c1, %c0_5] : memref<4x108xf32, #tpu.memory_space<vmem>>, vector<1x108xf32>
    %11 = vector.broadcast %9 : vector<8x1xf32> to vector<8x108xf32>
    %12 = vector.broadcast %10 : vector<1x108xf32> to vector<8x108xf32>
    %13 = arith.mulf %11, %12 : vector<8x108xf32>
    %14 = arith.addf %8, %13 : vector<8x108xf32>
    %15 = vector.extract_strided_slice %0 {offsets = [0, 2], sizes = [8, 1], strides = [1, 1]} : vector<8x4xf32> to vector<8x1xf32>
    %c2 = arith.constant 2 : index
    %c0_6 = arith.constant 0 : index
    %16 = vector.load %arg2[%c2, %c0_6] : memref<4x108xf32, #tpu.memory_space<vmem>>, vector<1x108xf32>
    %17 = vector.broadcast %15 : vector<8x1xf32> to vector<8x108xf32>
    %18 = vector.broadcast %16 : vector<1x108xf32> to vector<8x108xf32>
    %19 = arith.mulf %17, %18 : vector<8x108xf32>
    %20 = arith.addf %14, %19 : vector<8x108xf32>
    %21 = vector.extract_strided_slice %0 {offsets = [0, 3], sizes = [8, 1], strides = [1, 1]} : vector<8x4xf32> to vector<8x1xf32>
    %c3 = arith.constant 3 : index
    %c0_7 = arith.constant 0 : index
    %22 = vector.load %arg2[%c3, %c0_7] : memref<4x108xf32, #tpu.memory_space<vmem>>, vector<1x108xf32>
    %23 = vector.broadcast %21 : vector<8x1xf32> to vector<8x108xf32>
    %24 = vector.broadcast %22 : vector<1x108xf32> to vector<8x108xf32>
    %25 = arith.mulf %23, %24 : vector<8x108xf32>
    %26 = arith.addf %20, %25 : vector<8x108xf32>
    %c0_8 = arith.constant 0 : index
    %c0_9 = arith.constant 0 : index
    %27 = vector.load %arg4[%c0_8, %c0_9] : memref<1x108xf32, #tpu.memory_space<vmem>>, vector<1x108xf32>
    %cst = arith.constant 0.000000e+00 : f32
    %28 = vector.broadcast %cst : f32 to vector<1x108xf32>
    %29 = arith.cmpf one, %27, %28 : vector<1x108xf32>
    %30 = math.sin %26 : vector<8x108xf32>
    %31 = vector.shape_cast %29 : vector<1x108xi1> to vector<1x108xi1>
    %32 = vector.broadcast %31 : vector<1x108xi1> to vector<8x108xi1>
    %33 = arith.select %32, %26, %30 : vector<8x108xi1>, vector<8x108xf32>
    %c0_10 = arith.constant 0 : index
    %c0_11 = arith.constant 0 : index
    %34 = vector.load %arg5[%c0_10, %c0_11] : memref<8x108xf32, #tpu.memory_space<vmem>>, vector<8x108xf32>
    tpu.vector_store %arg5[%c0_10, %c0_11], %33 {strides = array<i32>} : memref<8x108xf32, #tpu.memory_space<vmem>>, vector<8x108xf32>,
    return
  }
  func.func @transform_0(%arg0: i32) -> (i32, i32) {
    %c0_i32 = arith.constant 0 : i32
    %c0_i32_0 = arith.constant 0 : i32
    return %arg0, %c0_i32 : i32, i32
  }
  func.func @transform_1(%arg0: i32) -> (i32, i32) {
    %c0_i32 = arith.constant 0 : i32
    %c0_i32_0 = arith.constant 0 : i32
    %c0_i32_1 = arith.constant 0 : i32
    return %c0_i32, %c0_i32_0 : i32, i32
  }
  func.func @transform_2(%arg0: i32) -> (i32, i32) {
    %c0_i32 = arith.constant 0 : i32
    %c0_i32_0 = arith.constant 0 : i32
    %c0_i32_1 = arith.constant 0 : i32
    return %c0_i32, %c0_i32_0 : i32, i32
  }
  func.func @transform_3(%arg0: i32) -> (i32, i32) {
    %c0_i32 = arith.constant 0 : i32
    %c0_i32_0 = arith.constant 0 : i32
    %c0_i32_1 = arith.constant 0 : i32
    return %c0_i32, %c0_i32_0 : i32, i32
  }
  func.func @transform_4(%arg0: i32) -> (i32, i32) {
    %c0_i32 = arith.constant 0 : i32
    %c0_i32_0 = arith.constant 0 : i32
    return %arg0, %c0_i32 : i32, i32
  }
}

</mosaic_0001>

<bundles_post_ra>
// kernel: tpu_custom_call.1
= control target key start
LH: loop header
LB: loop body
LE: loop exit
PB: predicated region body
PF: predicated region fallthrough
CT: control target
= control target key end

     0   :  { %v257_v1 = vmov 0   ;;  %v258_v2 = vmov 2   ;;  %s350_s0 = inlined_call_operand.vmem [shape: f32[8,4], index: 0, kind: input, shape index: {}]   ;;  %s351_s1 = inlined_call_operand.vmem [shape: f32[4,108], index: 1, kind: input, shape index: {}]   ;;  %s352_s2 = inlined_call_operand.vmem [shape: f32[1,108], index: 2, kind: input, shape index: {}]   ;;  %s353_s3 = inlined_call_operand.vmem [shape: f32[1,108], index: 3, kind: input, shape index: {}]   ;;  %s354_s4 = inlined_call_operand.hbm [shape: f32[8,108], index: 4, kind: output, shape index: {}]  }
   0x1   :  { %v18_v0 = vld [vmem:[%s350_s0] sm:$0xff]  ;;  %224 = vset.pattern.permute.xlu0 %v257_v1  ;;  %226 = vset.pattern.permute.xlu1 %v258_v2 }
   0x2   :  { %23 = vperm.xlu0 %224, %v18_v0   ;;  %51 = vperm.xlu1 %226, %v18_v0  }
   0x3   :  { %9 = vsyncpa [#allocation3], 0  ;;  %v259_v3 = vmov 1   ;;  %v260_v4 = vmov 3   ;;  %v200_v5 = vld [vmem:[%s351_s1] ss:$0 sm:$0xff] }
   0x4   :  { %v201_v9 = vld [vmem:[%s352_s2] ss:$0 sm:$0xff]  ;;  %v202_v10 = vld [vmem:[%s351_s1 + $0x1] ss:$0 sm:$0xff]  ;;  %v203_v11 = vld [vmem:[%s351_s1 + $0x2] ss:$0 sm:$0xff] }
   0x5   :  { %v204_v13 = vld [vmem:[%s351_s1 + $0x3] ss:$0 sm:$0xff]  ;;  %v261_v32 = vmov 683565275   ;;  %v262_v34 = vmov 2475754826  }
   0x6   :  { %225 = vset.pattern.permute.xlu0 %v259_v3  ;;  %227 = vset.pattern.permute.xlu1 %v260_v4  ;;  %v263_v37 = vmov 2131351028   ;;  %v264_v40 = vmov 2102212464   ;;  %v265_v43 = vmov 920167782  }
   0x7   :  { %40 = vperm.xlu0 %225, %v18_v0   ;;  %62 = vperm.xlu1 %227, %v18_v0   ;;  %v266_v46 = vmov 1326507024   ;;  %s267_s26 = smov [#allocation2]   ;;  %vm184_vm15 = vcmask 883712  }
   0x8   :  { %s192_s27 = sshll.u32 %s267_s26, 4  ;;  %s193_s27 = int_to_ptr.vmem [resolvable:$true] %s192_s27 }
   0x9   :  { %p238_p1 = scmp.lt.s32.totalorder %s193_s27, %s193_s27 }
   0xb   :  { %228 = vset.pattern.permute.xlu0 %v260_v4 }
  0x81   :  { %v24_v6 = vpop.permute.xlu0 %23  ;;  %v52_v7 = vpop.permute.xlu1 %51 }
  0x82   :  { %v30_v8 = vmul.f32 %v200_v5, %v24_v6  ;;  %v58_v17 = vmul.f32 %v203_v11, %v52_v7 }
  0x84   :  { %v37_v15 = vadd.f32 %v201_v9, %v30_v8 }
  0x86   :  { %v41_v12 = vpop.permute.xlu0 %40  ;;  %v63_v14 = vpop.permute.xlu1 %62 }
  0x87   :  { %v47_v16 = vmul.f32 %v202_v10, %v41_v12  ;;  %v69_v19 = vmul.f32 %v204_v13, %v63_v14 }
  0x89   :  { %v48_v18 = vadd.f32 %v47_v16, %v37_v15 }
  0x8b   :  { %v59_v20 = vadd.f32 %v58_v17, %v48_v18 }
  0x8d   :  { %v312_v21 = vadd.f32 %v69_v19, %v59_v20 }
  0x8f   :  { %v76_v22 = vand.u32 2139095040, %v312_v21  ;;  %v73_v26 = vand.u32 2147483647, %v312_v21  ;;  %vm75_vm7 = vcmp.lt.s32.totalorder %v312_v21, 0  ;;  %vm165_vm14 = vweird.f32 %v312_v21 }
  0x91   :  { %v77_v23 = vshrl.u32 %v76_v22, 23  ;;  %v80_v30 = vand.u32 8388607, %v73_v26  ;;  %vm74_vm8 = vcmp.le.f32.partialorder %v73_v26, 0.7853982 }
  0x93   :  { %v205_v24 = vadd.s32 4294967169, %v77_v23  ;;  %v81_v48 = vor.u32 8388608, %v80_v30 }
  0x95   :  { %v83_v25 = vadd.s32 1, %v205_v24  ;;  %v121_v62 = vshll.u32 %v81_v48, 8 }
  0x97   :  { %vm84_vm0 = vcmp.gt.s32.totalorder %v83_v25, 0 }
  0x98   :  { %v85_v27 = vsel %vm84_vm0, %v83_v25, 0 }
  0x99   :  { %v87_v28 = vand.u32 31, %v85_v27  ;;  %v86_v31 = vshrl.u32 %v85_v27, 5 }
  0x9b   :  { %v88_v29 = vsub.s32 32, %v87_v28  ;;  %v90_v33 = vshll.u32 %v261_v32, %v87_v28  ;;  %v93_v35 = vshll.u32 %v262_v34, %v87_v28  ;;  %v96_v39 = vshll.u32 %v263_v37, %v87_v28 }
  0x9c   :  { %v99_v42 = vshll.u32 %v264_v40, %v87_v28  ;;  %v102_v45 = vshll.u32 %v265_v43, %v87_v28  ;;  %vm105_vm1 = vcmp.lt.s32.totalorder %v86_v31, 1  ;;  %vm108_vm2 = vcmp.lt.s32.totalorder %v86_v31, 4 }
  0x9d   :  { %v91_v36 = vshrl.u32 %v262_v34, %v88_v29  ;;  %v94_v38 = vshrl.u32 %v263_v37, %v88_v29  ;;  %v97_v41 = vshrl.u32 %v264_v40, %v88_v29  ;;  %v100_v44 = vshrl.u32 %v265_v43, %v88_v29 }
  0x9e   :  { %v103_v47 = vshrl.u32 %v266_v46, %v88_v29  ;;  %v89_v57 = vshrl.u32 %v261_v32, %v88_v29  ;;  %vm107_vm3 = vcmp.lt.s32.totalorder %v86_v31, 3  ;;  %vm106_vm4 = vcmp.lt.s32.totalorder %v86_v31, 2 }
  0x9f   :  { %v92_v49 = vor.u32 %v91_v36, %v90_v33  ;;  %v95_v50 = vor.u32 %v94_v38, %v93_v35  ;;  %v98_v51 = vor.u32 %v97_v41, %v96_v39  ;;  %v101_v52 = vor.u32 %v100_v44, %v99_v42  ;;  %v71_v42 = vld [vmem:[%s353_s3] sm:$0x1]  ;;  %s233_s3 = scalar_lea.vmem %s193_s27, 128 }
  0xa0   :  { %v104_v53 = vor.u32 %v103_v47, %v102_v45  ;;  %v178_v38 = vlaneseq  ;;  %vm72_vm9 = vcmp.ne.f32.partialorder %v71_v42, 0.0  ;;  %p234_p0 = scmp.ne.s32.totalorder %s193_s27, %s233_s3  ;;  %p239_p2 = scmp.lt.s32.totalorder %s233_s3, %s233_s3 }
  0xa1   :  { %v110_v54 = vsel %vm108_vm2, %v98_v51, 2102212464  ;;  %v113_v55 = vsel %vm105_vm1, %v92_v49, %v95_v50  ;;  %v117_v56 = vsel %vm105_vm1, %v95_v50, %v98_v51  ;;  %v114_v58 = vsel %vm108_vm2, %v101_v52, 920167782 }
  0xa2   :  { %v118_v59 = vsel %vm108_vm2, %v104_v53, 1326507024  ;;  %v115_v60 = vsel %vm107_vm3, %v98_v51, %v114_v58  ;;  %v109_v63 = vsel %vm105_vm1, %v89_v57, %v92_v49  ;;  %v111_v0 = vsel %vm107_vm3, %v95_v50, %v110_v54  ;;  %p240_p3 = por %p239_p2, %p238_p1 }
  0xa3   :  { %v119_v61 = vsel %vm107_vm3, %v101_v52, %v118_v59  ;;  %v116_v2 = vsel %vm106_vm4, %v113_v55, %v115_v60  ;;  %v112_v8 = vsel %vm106_vm4, %v109_v63, %v111_v0  ;;  %v179_v44 = vshrl.u32 %v178_v38, 7 }
  0xa4   :  { %v120_v3 = vsel %vm106_vm4, %v117_v56, %v119_v61  ;;  %v321_v6 = vmul.u32.u64.low %v121_v62, %v116_v2  ;;  %v322_v7 = vmul.u32.u64.high %v121_v62, %v116_v2, %v321_v6  ;;  %v128_v10 = vmul.u32 %v121_v62, %v112_v8  ;;  %p241_p4 = pnand %p240_p3, %p234_p0 }
  0xa5   :  { %v318_v4 = vmul.u32.u64.low %v121_v62, %v120_v3  ;;  %v319_v5 = vmul.u32.u64.high %v121_v62, %v120_v3, %v318_v4  ;;  %v180_v46 = vsub.s32 0, %v179_v44  ;;  %v177_v47 = vsel %vm72_vm9, 1, %v257_v1 }
  0xa6   :  { %v131_v9 = vadd.s32 1, %v322_v7 }
  0xa7   :  { %vm130_vm5 = vc.u32 %v319_v5, %v321_v6  ;;  %v129_v23 = vadd.s32 %v321_v6, %v319_v5  ;;  %v181_v26 = vrot.slane %v177_v47, %v180_v46 }
  0xa8   :  { %v132_v11 = vsel %vm130_vm5, %v131_v9, %v322_v7 }
  0xa9   :  { %v133_v12 = vadd.s32 %v132_v11, %v128_v10  ;;  %vm182_vm12 = vcmp.eq.s32.totalorder %v181_v26, 1 }
  0xab   :  { %v134_v13 = vadd.s32 536870912, %v133_v12 }
  0xad   :  { %v135_v14 = vshrl.u32 %v134_v13, 30 }
  0xaf   :  { %v136_v15 = vshll.u32 %v135_v14, 30  ;;  %v159_v36 = vsub.s32 4, %v135_v14 }
  0xb1   :  { %v137_v16 = vsub.s32 %v133_v12, %v136_v15  ;;  %v160_v40 = vsel %vm75_vm7, %v159_v36, %v135_v14 }
  0xb2   :  { %v162_v43 = vsel %vm74_vm8, 0, %v160_v40 }
  0xb3   :  { %v139_v17 = vsub.s32 0, %v137_v16  ;;  %v166_v45 = vadd.s32 3, %v162_v43 }
  0xb5   :  { %v206_v18 = vmin.u32 %v139_v17, %v137_v16  ;;  %v167_v48 = vand.u32 3, %v166_v45 }
  0xb7   :  { %v141_v19 = vclz %v206_v18  ;;  %vm172_vm10 = vcmp.eq.s32.totalorder %v167_v48, 2  ;;  %vm169_vm11 = vcmp.eq.s32.totalorder %v167_v48, 0  ;;  %vm168_vm13 = vcmp.lt.s32.totalorder %v167_v48, 2 }
  0xb9   :  { %v207_v20 = vadd.s32 4294967294, %v141_v19 }
  0xbb   :  { %vm208_vm6 = vcmp.lt.s32.totalorder %v207_v20, 0 }
  0xbc   :  { %v144_v22 = vsel %vm208_vm6, 0, %v207_v20 }
  0xbd   :  { %v145_v24 = vsub.s32 32, %v144_v22  ;;  %v149_v25 = vsub.s32 4294967266, %v144_v22  ;;  %v146_v27 = vshll.u32 %v137_v16, %v144_v22 }
  0xbf   :  { %v147_v28 = vshrl.u32 %v129_v23, %v145_v24  ;;  %v150_v29 = vadd.s32 127, %v149_v25 }
  0xc1   :  { %v148_v30 = vor.u32 %v147_v28, %v146_v27  ;;  %v151_v31 = vshll.u32 %v150_v29, 23 }
  0xc3   :  { %v152_v32 = vor.u32 4788187, %v151_v31  ;;  %v155_v34 = vcvt.s32.f32 %v148_v30 }
  0xc5   :  { %v153_v33 = vand.u32 2147483647, %v152_v32 }
  0xc7   :  { %v156_v35 = vmul.f32 %v155_v34, %v153_v33 }
  0xc9   :  { %v157_v37 = vxor.u32 2147483648, %v156_v35 }
  0xcb   :  { %v158_v39 = vsel %vm75_vm7, %v157_v37, %v156_v35 }
  0xcc   :  { %v161_v41 = vsel %vm74_vm8, %v312_v21, %v158_v39 }
  0xcd   :  { %229 = vcosq.f32 %v161_v41 }
  0xce   :  { %231 = vsinq.f32 %v161_v41 }
  0xd7   :  { %v230_v49 = vpop.eup %229 }
  0xd8   :  { %v232_v50 = vpop.eup %231  ;;  %v173_v51 = vxor.u32 2147483648, %v230_v49 }
  0xd9   :  { %v170_v52 = vxor.u32 2147483648, %v232_v50 }
  0xda   :  { %v174_v53 = vsel %vm172_vm10, %v173_v51, %v232_v50 }
  0xdb   :  { %v171_v54 = vsel %vm169_vm11, %v230_v49, %v170_v52 }
  0xdc   :  { %v175_v55 = vsel %vm168_vm13, %v171_v54, %v174_v53 }
  0xdd   :  { %v176_v56 = vsel %vm165_vm14, nan, %v175_v55 }
  0xde   :  { %v183_v1 = vsel %vm182_vm12, %v312_v21, %v176_v56 }
  0xdf   :  { %185 = vst.msk [vmem:[#allocation2] sm:$0xff] %vm184_vm15, %v183_v1 }
  0xe0   :  { %244 = shalt.err (!%p241_p4)
}
  0xe1   :  { %s245_s30 = scalar_lea.hbm %s354_s4, 128 }
  0xe2   :  { %p246_p5 = scmp.ne.s32.totalorder %s354_s4, %s245_s30  ;;  %p249_p6 = scmp.lt.u32.totalorder %s245_s30, %s354_s4 }
  0xe4   :  { %p251_p7 = pnand %p249_p6, %p246_p5 }
  0xe6   :  { %254 = shalt.err (!%p251_p7)
}
  0xe7   :  { %195 = dma.vmem_to_hbm [thread:$0]  %s193_s27, 128, %s354_s4, [#allocation3]  }
  0xe8   :  { %255 = dma.done.wait [#allocation3], 128  }
  0xe9   :  { %256 = vsyncadd [#allocation3], 4294967168 }
  0xea   :  { %199 = vsyncpa [#allocation3], 1 }

</bundles_post_ra>
